<compile_context>
chip_gen: v5e
topology: v5e:2x2
jax: 0.10.0
libtpu: 0.0.40
codegen_flags: <defaults>
</compile_context>

<pallas_src>
import functools
import math

import jax
import jax.numpy as jnp
from jax.experimental import pallas as pl
from jax.experimental.pallas import tpu as pltpu


# ------------------------------ fused encoder kernel ------------------------------

def _bert_layer_kernel(emb_hbm, mask_ref,
                       qkvw_ref, qkvb_ref, ow_ref, ob_ref, l1g_ref, l1b_ref,
                       iw_ref, ib_ref, fw_ref, fb_ref, l2g_ref, l2b_ref,
                       cls_ref,
                       h_ref, qkv_ref, ctx_ref, emb_sem,
                       *, Bt, S, H, nH, Dh, eps):
    bt = pl.program_id(0)            # batch-tile index ("parallel")
    layer = pl.program_id(1)         # layer index ("arbitrary" — strictly sequential)
    n_layers = pl.num_programs(1)
    R = Bt * S
    scale = 1.0 / math.sqrt(Dh)

    def layernorm(x, g, b):          # f32 statistics
        mean = jnp.mean(x, axis=-1, keepdims=True)
        var = jnp.mean(jnp.square(x - mean), axis=-1, keepdims=True)
        return (x - mean) * jax.lax.rsqrt(var + eps) * g + b

    def gelu(y):
        # TODO(synk): tanh-approximate GELU; BERT's exact erf GELU matches only to ~1e-3.
        inner = 0.7978845608028654 * (y + 0.044715 * (y * jnp.square(y)))
        return 0.5 * y * (1.0 + jnp.tanh(inner))

    # Layer 0: one-shot DMA of this batch tile's (already LayerNormed) embeddings from HBM
    # into the VMEM-resident hidden state — no pipelined VMEM window is held for it.
    @pl.when(layer == 0)
    def _():
        cp = pltpu.make_async_copy(emb_hbm.at[pl.ds(bt * R, R), :], h_ref, emb_sem)
        cp.start()
        cp.wait()

    x = h_ref[...]                                   # (R, H) f32, resident across layers
    x_bf = x.astype(jnp.bfloat16)

    # Fused QKV projection (bf16 x bf16 -> f32 accumulate), written to a bf16 scratch so the
    # (R, 3H) result never stays live as a value across the head loop.
    qkv = jnp.dot(x_bf, qkvw_ref[0], preferred_element_type=jnp.float32) + qkvb_ref[0]
    qkv_ref[...] = qkv.astype(jnp.bfloat16)

    mask3 = mask_ref[...][:, None, :]                # (Bt, 1, S) additive mask, f32 (hoisted)

    # Attention: static loop over heads; matmuls batched over the batch tile (3-D dot_general).
    for hd in range(nH):
        c0 = hd * Dh
        q = qkv_ref[:, c0:c0 + Dh].reshape(Bt, S, Dh)                    # bf16
        k = qkv_ref[:, H + c0:H + c0 + Dh].reshape(Bt, S, Dh)
        v = qkv_ref[:, 2 * H + c0:2 * H + c0 + Dh].reshape(Bt, S, Dh)

        s = jnp.einsum('bqd,bkd->bqk', q, k,
                       preferred_element_type=jnp.float32) * scale + mask3
        p = jnp.exp(s - jnp.max(s, axis=-1, keepdims=True))             # f32, unnormalised
        denom = jnp.sum(p, axis=-1, keepdims=True)                      # (Bt, S, 1) f32
        ctx = jnp.einsum('bqk,bkd->bqd', p.astype(jnp.bfloat16), v,
                         preferred_element_type=jnp.float32)
        # Normalise in the (S, Dh) domain instead of the (S, S) domain (far fewer VALU muls).
        ctx = ctx * pl.reciprocal(denom, approx=True)
        ctx_ref[:, c0:c0 + Dh] = ctx.reshape(R, Dh).astype(jnp.bfloat16)  # direct ref store

    attn_out = jnp.dot(ctx_ref[...], ow_ref[0],
                       preferred_element_type=jnp.float32) + ob_ref[0]
    h1 = layernorm(attn_out + x, l1g_ref[0], l1b_ref[0])

    inter = gelu(jnp.dot(h1.astype(jnp.bfloat16), iw_ref[0],
                         preferred_element_type=jnp.float32) + ib_ref[0])
    ffn = jnp.dot(inter.astype(jnp.bfloat16), fw_ref[0],
                  preferred_element_type=jnp.float32) + fb_ref[0]
    h2 = layernorm(ffn + h1, l2g_ref[0], l2b_ref[0])
    h_ref[...] = h2                                  # stays in VMEM for the next layer

    # Final layer: single strided load of the [CLS] rows -> lane-dense (Bt, H) output block.
    @pl.when(layer == n_layers - 1)
    def _():
        cls_ref[...] = h_ref[pl.ds(0, Bt, stride=S), :].astype(cls_ref.dtype)


# --------------------------------- forward glue --------------------------------

def text_classification_forward(params, enc_inputs, attention_mask, token_type_ids,
                                *, batch_tile=None):
    """Equivalent of TextClassification.forward -> logits of shape (B, 1)."""
    B, S = enc_inputs.shape
    H = params["word_emb"].shape[1]
    nH = params["num_heads"]
    Dh = H // nH
    L = params["qkv_w"].shape[0]
    I = params["i_w"].shape[2]
    Bt = B if batch_tile is None else batch_tile
    assert B % Bt == 0
    R = Bt * S
    eps = 1e-12

    # --- glue: embedding gathers + embedding LayerNorm (runs once) ---
    we = jnp.take(params["word_emb"], enc_inputs, axis=0)                 # (B, S, H)
    te = jnp.take(params["type_emb"], token_type_ids, axis=0)             # (B, S, H)
    pe = params["pos_emb"][:S][None, :, :]                                # (1, S, H)
    emb = (we + te + pe).astype(jnp.float32)
    mean = jnp.mean(emb, axis=-1, keepdims=True)
    var = jnp.mean(jnp.square(emb - mean), axis=-1, keepdims=True)
    emb = ((emb - mean) * jax.lax.rsqrt(var + eps) * params["emb_ln_g"]
           + params["emb_ln_b"]).reshape(B * S, H)                        # layer-0 hidden

    mask_add = (1.0 - attention_mask.astype(jnp.float32)) * -1e9          # (B, S) additive

    # --- bf16 weight streaming; biases / LayerNorm params stay f32 ---
    bf = jnp.bfloat16
    qkv_w = params["qkv_w"].astype(bf)
    o_w = params["o_w"].astype(bf)
    i_w = params["i_w"].astype(bf)
    f_w = params["f_w"].astype(bf)

    kern = functools.partial(_bert_layer_kernel, Bt=Bt, S=S, H=H, nH=nH, Dh=Dh, eps=eps)

    per_layer3 = lambda bt, l: (l, 0, 0)
    per_tile2 = lambda bt, l: (bt, 0)

    # Explicit VMEM budget: resident scratches + double-buffered per-layer weight blocks.
    per_layer_bytes = (2 * (H * 3 * H + H * H + H * I + I * H)            # bf16 weights
                       + 4 * (3 * H + H + I + H + 4 * H))                 # f32 biases + LN
    resident_bytes = R * H * 4 + R * 3 * H * 2 + R * H * 2                # h, qkv, ctx scratches
    vmem_budget = resident_bytes + 2 * per_layer_bytes + Bt * H * 4 + Bt * S * 4
    vmem_limit = int(min(max(2 * vmem_budget, 32 * 1024 * 1024), 96 * 1024 * 1024))

    cls_hidden = pl.pallas_call(
        kern,
        out_shape=jax.ShapeDtypeStruct((B, H), jnp.float32),
        grid=(B // Bt, L),
        in_specs=[
            pl.BlockSpec(memory_space=pl.ANY),          # LayerNormed embeddings (HBM, DMA once)
            pl.BlockSpec((Bt, S), per_tile2),           # additive attention mask
            pl.BlockSpec((1, H, 3 * H), per_layer3),    # fused QKV weight (bf16)
            pl.BlockSpec((1, 1, 3 * H), per_layer3),    # fused QKV bias (f32)
            pl.BlockSpec((1, H, H), per_layer3),        # attn output weight (bf16)
            pl.BlockSpec((1, 1, H), per_layer3),        # attn output bias
            pl.BlockSpec((1, 1, H), per_layer3),        # ln1 gamma
            pl.BlockSpec((1, 1, H), per_layer3),        # ln1 beta
            pl.BlockSpec((1, H, I), per_layer3),        # intermediate weight (bf16)
            pl.BlockSpec((1, 1, I), per_layer3),        # intermediate bias
            pl.BlockSpec((1, I, H), per_layer3),        # FFN output weight (bf16)
            pl.BlockSpec((1, 1, H), per_layer3),        # FFN output bias
            pl.BlockSpec((1, 1, H), per_layer3),        # ln2 gamma
            pl.BlockSpec((1, 1, H), per_layer3),        # ln2 beta
        ],
        out_specs=pl.BlockSpec((Bt, H), per_tile2),
        scratch_shapes=[
            pltpu.VMEM((R, H), jnp.float32),            # resident hidden state
            pltpu.VMEM((R, 3 * H), jnp.bfloat16),       # fused QKV scratch
            pltpu.VMEM((R, H), jnp.bfloat16),           # attention context scratch
            pltpu.SemaphoreType.DMA,                    # embedding-load semaphore
        ],
        compiler_params=pltpu.CompilerParams(
            dimension_semantics=("parallel", "arbitrary"),
            vmem_limit_bytes=vmem_limit),
    )(
        emb, mask_add,
        qkv_w, params["qkv_b"],
        o_w, params["o_b"],
        params["ln1_g"], params["ln1_b"],
        i_w, params["i_b"],
        f_w, params["f_b"],
        params["ln2_g"], params["ln2_b"],
    )

    # --- glue: pooler (dense + tanh on [CLS]) + width-1 classifier, runs once on (B, H) ---
    pooled = jnp.tanh(cls_hidden @ params["pool_w"] + params["pool_b"])
    logits = pooled @ params["cls_w"] + params["cls_b"]
    return logits


# --------------------------- deterministic param init ---------------------------

def init_params(key, *, vocab, hidden, num_layers, num_heads,
                intermediate, max_pos, type_vocab):
    def norm(k, shape):
        return (0.02 * jax.random.normal(k, shape)).astype(jnp.float32)

    def zeros(*shape):
        return jnp.zeros(shape, jnp.float32)

    def ones(*shape):
        return jnp.ones(shape, jnp.float32)

    k_emb, k_pos, k_type, k_layers, k_pool, k_cls = jax.random.split(key, 6)

    layers = []
    lkey = k_layers
    for _ in range(num_layers):
        lkey, kq, kk, kv, ko, ki, kf = jax.random.split(lkey, 7)
        layers.append({
            "q_w": norm(kq, (hidden, hidden)), "q_b": zeros(hidden),
            "k_w": norm(kk, (hidden, hidden)), "k_b": zeros(hidden),
            "v_w": norm(kv, (hidden, hidden)), "v_b": zeros(hidden),
            "o_w": norm(ko, (hidden, hidden)), "o_b": zeros(hidden),
            "ln1_g": ones(hidden), "ln1_b": zeros(hidden),
            "i_w": norm(ki, (hidden, intermediate)), "i_b": zeros(intermediate),
            "f_w": norm(kf, (intermediate, hidden)), "f_b": zeros(hidden),
            "ln2_g": ones(hidden), "ln2_b": zeros(hidden),
        })

    def stack_mat(name):
        return jnp.stack([lp[name] for lp in layers], axis=0)

    def stack_vec(name):
        return jnp.stack([lp[name][None, :] for lp in layers], axis=0)

    params = {
        "num_heads": num_heads,
        "word_emb": norm(k_emb, (vocab, hidden)),
        "pos_emb": norm(k_pos, (max_pos, hidden)),
        "type_emb": norm(k_type, (type_vocab, hidden)),
        "emb_ln_g": ones(hidden),
        "emb_ln_b": zeros(hidden),
        # fused QKV: (L, H, 3H) weight, (L, 1, 3H) bias (column order: Q heads | K heads | V heads)
        "qkv_w": jnp.stack([jnp.concatenate([lp["q_w"], lp["k_w"], lp["v_w"]], axis=1)
                            for lp in layers], axis=0),
        "qkv_b": jnp.stack([jnp.concatenate([lp["q_b"], lp["k_b"], lp["v_b"]])[None, :]
                            for lp in layers], axis=0),
        "o_w": stack_mat("o_w"), "o_b": stack_vec("o_b"),
        "ln1_g": stack_vec("ln1_g"), "ln1_b": stack_vec("ln1_b"),
        "i_w": stack_mat("i_w"), "i_b": stack_vec("i_b"),
        "f_w": stack_mat("f_w"), "f_b": stack_vec("f_b"),
        "ln2_g": stack_vec("ln2_g"), "ln2_b": stack_vec("ln2_b"),
        "pool_w": norm(k_pool, (hidden, hidden)),
        "pool_b": zeros(hidden),
        "cls_w": norm(k_cls, (hidden, 1)),
        "cls_b": zeros(1),
    }
    return params


# ------------------------------------- main -------------------------------------

if __name__ == "__main__":
    # TODO(synk): pretrained-checkpoint loading and the `freeze` flags are training-time
    # concerns with no forward-pass effect; parameters are synthesized deterministically.
    B, S = 2, 8
    VOCAB, HIDDEN, LAYERS, HEADS, INTER, MAX_POS, TYPE_VOCAB = 100, 32, 2, 2, 64, 16, 2

    key = jax.random.PRNGKey(0)
    k_params, k_ids = jax.random.split(key)
    params = init_params(k_params, vocab=VOCAB, hidden=HIDDEN, num_layers=LAYERS,
                         num_heads=HEADS, intermediate=INTER, max_pos=MAX_POS,
                         type_vocab=TYPE_VOCAB)

    enc_inputs = jax.random.randint(k_ids, (B, S), 0, VOCAB, dtype=jnp.int32)
    attention_mask = jnp.ones((B, S), dtype=jnp.int32).at[1, 6:].set(0)
    token_type_ids = jnp.zeros((B, S), dtype=jnp.int32)

    logits = text_classification_forward(params, enc_inputs, attention_mask, token_type_ids)
    logits = jax.block_until_ready(logits)
    assert logits.shape == (B, 1) and logits.dtype == jnp.float32
    print("KERNEL_OK")
</pallas_src>

<mosaic_0001>
module attributes {stable_mosaic.version = 11 : i64} {
  func.func @_bert_layer_kernel(%arg0: i32, %arg1: i32, %arg2: memref<16x32xf32, #tpu.memory_space<any>>, %arg3: memref<2x8xf32, #tpu.memory_space<vmem>>, %arg4: memref<1x32x96xbf16, #tpu.memory_space<vmem>>, %arg5: memref<1x1x96xf32, #tpu.memory_space<vmem>>, %arg6: memref<1x32x32xbf16, #tpu.memory_space<vmem>>, %arg7: memref<1x1x32xf32, #tpu.memory_space<vmem>>, %arg8: memref<1x1x32xf32, #tpu.memory_space<vmem>>, %arg9: memref<1x1x32xf32, #tpu.memory_space<vmem>>, %arg10: memref<1x32x64xbf16, #tpu.memory_space<vmem>>, %arg11: memref<1x1x64xf32, #tpu.memory_space<vmem>>, %arg12: memref<1x64x32xbf16, #tpu.memory_space<vmem>>, %arg13: memref<1x1x32xf32, #tpu.memory_space<vmem>>, %arg14: memref<1x1x32xf32, #tpu.memory_space<vmem>>, %arg15: memref<1x1x32xf32, #tpu.memory_space<vmem>>, %arg16: memref<2x32xf32, #tpu.memory_space<vmem>>, %arg17: memref<16x32xf32, #tpu.memory_space<vmem>>, %arg18: memref<16x96xbf16, #tpu.memory_space<vmem>>, %arg19: memref<16x32xbf16, #tpu.memory_space<vmem>>, %arg20: memref<!tpu.dma_semaphore, #tpu.memory_space<semaphore_mem>>) attributes {dimension_semantics = [#tpu.dimension_semantics<parallel>, #tpu.dimension_semantics<arbitrary>], iteration_bounds = array<i64: 1, 2>, scalar_prefetch = 0 : i64, scratch_operands = 4 : i64, tpu.core_type = #tpu.core_type<tc>, window_params = [{}, {transform_indices = @transform_1, window_bounds = array<i64: 2, 8>}, {transform_indices = @transform_2, window_bounds = array<i64: 1, 32, 96>}, {transform_indices = @transform_3, window_bounds = array<i64: 1, 1, 96>}, {transform_indices = @transform_4, window_bounds = array<i64: 1, 32, 32>}, {transform_indices = @transform_5, window_bounds = array<i64: 1, 1, 32>}, {transform_indices = @transform_6, window_bounds = array<i64: 1, 1, 32>}, {transform_indices = @transform_7, window_bounds = array<i64: 1, 1, 32>}, {transform_indices = @transform_8, window_bounds = array<i64: 1, 32, 64>}, {transform_indices = @transform_9, window_bounds = array<i64: 1, 1, 64>}, {transform_indices = @transform_10, window_bounds = array<i64: 1, 64, 32>}, {transform_indices = @transform_11, window_bounds = array<i64: 1, 1, 32>}, {transform_indices = @transform_12, window_bounds = array<i64: 1, 1, 32>}, {transform_indices = @transform_13, window_bounds = array<i64: 1, 1, 32>}, {transform_indices = @transform_14, window_bounds = array<i64: 2, 32>}]} {
    %c0_i32 = arith.constant 0 : i32
    %0 = arith.cmpi eq, %arg1, %c0_i32 : i32
    %1 = arith.extui %0 : i1 to i32
    %c0_i32_0 = arith.constant 0 : i32
    %2 = arith.cmpi ne, %1, %c0_i32_0 : i32
    scf.if %2 {
      %c16_i32 = arith.constant 16 : i32
      %163 = arith.muli %arg0, %c16_i32 : i32
      %c0_i32_85 = arith.constant 0 : i32
      %164 = tpu.memref_slice %arg2[%163, %c0_i32_85] : memref<16x32xf32, #tpu.memory_space<any>> -> memref<16x32xf32, #tpu.memory_space<any>>
      tpu.enqueue_dma source(%164 : memref<16x32xf32, #tpu.memory_space<any>>) target(%arg17 : memref<16x32xf32, #tpu.memory_space<vmem>>) target_semaphore(%arg20 : memref<!tpu.dma_semaphore, #tpu.memory_space<semaphore_mem>>)
      %c0_i32_86 = arith.constant 0 : i32
      %165 = tpu.memref_slice %arg2[%163, %c0_i32_86] : memref<16x32xf32, #tpu.memory_space<any>> -> memref<16x32xf32, #tpu.memory_space<any>>
      tpu.wait_dma2 semaphore(%arg20 : memref<!tpu.dma_semaphore, #tpu.memory_space<semaphore_mem>>) src(%165 : memref<16x32xf32, #tpu.memory_space<any>>) dst(%arg17 : memref<16x32xf32, #tpu.memory_space<vmem>>)
    } else {
    }
    %c0 = arith.constant 0 : index
    %c0_1 = arith.constant 0 : index
    %3 = vector.load %arg17[%c0, %c0_1] : memref<16x32xf32, #tpu.memory_space<vmem>>, vector<16x32xf32>
    %4 = arith.truncf %3 : vector<16x32xf32> to vector<16x32xbf16>
    %c0_2 = arith.constant 0 : index
    %c0_3 = arith.constant 0 : index
    %c0_4 = arith.constant 0 : index
    %5 = vector.load %arg4[%c0_2, %c0_3, %c0_4] : memref<1x32x96xbf16, #tpu.memory_space<vmem>>, vector<1x32x96xbf16>
    %6 = vector.shape_cast %5 : vector<1x32x96xbf16> to vector<32x96xbf16>
    %cst = arith.constant dense<0.000000e+00> : vector<16x96xf32>
    %7 = tpu.matmul %4, %6, %cst {dimension_numbers = #tpu.dot_dimension_numbers<[1], [0], [0], [1], [0, 0, 1, 1], [], []>} : vector<16x32xbf16>, vector<32x96xbf16>, vector<16x96xf32> -> vector<16x96xf32>
    %c0_5 = arith.constant 0 : index
    %c0_6 = arith.constant 0 : index
    %c0_7 = arith.constant 0 : index
    %8 = vector.load %arg5[%c0_5, %c0_6, %c0_7] : memref<1x1x96xf32, #tpu.memory_space<vmem>>, vector<1x1x96xf32>
    %9 = vector.shape_cast %8 : vector<1x1x96xf32> to vector<1x96xf32>
    %10 = vector.broadcast %9 : vector<1x96xf32> to vector<16x96xf32>
    %11 = arith.addf %7, %10 : vector<16x96xf32>
    %12 = arith.truncf %11 : vector<16x96xf32> to vector<16x96xbf16>
    %c0_8 = arith.constant 0 : index
    %c0_9 = arith.constant 0 : index
    %13 = vector.load %arg18[%c0_8, %c0_9] : memref<16x96xbf16, #tpu.memory_space<vmem>>, vector<16x96xbf16>
    tpu.vector_store %arg18[%c0_8, %c0_9], %12 {strides = array<i32>} : memref<16x96xbf16, #tpu.memory_space<vmem>>, vector<16x96xbf16>,
    %c0_10 = arith.constant 0 : index
    %c0_11 = arith.constant 0 : index
    %14 = vector.load %arg3[%c0_10, %c0_11] : memref<2x8xf32, #tpu.memory_space<vmem>>, vector<2x8xf32>
    %15 = vector.shape_cast %14 : vector<2x8xf32> to vector<2x1x8xf32>
    %c0_12 = arith.constant 0 : index
    %c0_13 = arith.constant 0 : index
    %16 = vector.load %arg18[%c0_12, %c0_13] : memref<16x96xbf16, #tpu.memory_space<vmem>>, vector<16x16xbf16>
    %17 = vector.shape_cast %16 : vector<16x16xbf16> to vector<2x8x16xbf16>
    %c0_14 = arith.constant 0 : index
    %c32 = arith.constant 32 : index
    %18 = vector.load %arg18[%c0_14, %c32] : memref<16x96xbf16, #tpu.memory_space<vmem>>, vector<16x16xbf16>
    %19 = vector.shape_cast %18 : vector<16x16xbf16> to vector<2x8x16xbf16>
    %c0_15 = arith.constant 0 : index
    %c64 = arith.constant 64 : index
    %20 = vector.load %arg18[%c0_15, %c64] : memref<16x96xbf16, #tpu.memory_space<vmem>>, vector<16x16xbf16>
    %21 = vector.shape_cast %20 : vector<16x16xbf16> to vector<2x8x16xbf16>
    "tpu.trace_start"() <{level = 10 : i32, message = "bqd,bkd->bqk"}> : () -> ()
    %cst_16 = arith.constant dense<0.000000e+00> : vector<2x8x8xf32>
    %22 = tpu.matmul %17, %19, %cst_16 {dimension_numbers = #tpu.dot_dimension_numbers<[2], [2], [1], [1], [0, 0, 0, 1, 1, 1], [0], [0]>} : vector<2x8x16xbf16>, vector<2x8x16xbf16>, vector<2x8x8xf32> -> vector<2x8x8xf32>
    "tpu.trace_stop"() : () -> ()
    %cst_17 = arith.constant 2.500000e-01 : f32
    %23 = vector.broadcast %cst_17 : f32 to vector<2x8x8xf32>
    %24 = arith.mulf %22, %23 : vector<2x8x8xf32>
    %25 = vector.broadcast %15 : vector<2x1x8xf32> to vector<2x8x8xf32>
    %26 = arith.addf %24, %25 : vector<2x8x8xf32>
    %cst_18 = arith.constant dense<0xFF800000> : vector<2x8xf32>
    %27 = vector.multi_reduction <maximumf>, %26, %cst_18 [2] : vector<2x8x8xf32> to vector<2x8xf32>
    %28 = vector.shape_cast %27 : vector<2x8xf32> to vector<2x8x1xf32>
    %29 = vector.broadcast %28 : vector<2x8x1xf32> to vector<2x8x8xf32>
    %30 = arith.subf %26, %29 : vector<2x8x8xf32>
    %31 = math.exp %30 : vector<2x8x8xf32>
    %cst_19 = arith.constant dense<0.000000e+00> : vector<2x8xf32>
    %32 = vector.multi_reduction <add>, %31, %cst_19 [2] : vector<2x8x8xf32> to vector<2x8xf32>
    %33 = vector.shape_cast %32 : vector<2x8xf32> to vector<2x8x1xf32>
    %34 = arith.truncf %31 : vector<2x8x8xf32> to vector<2x8x8xbf16>
    "tpu.trace_start"() <{level = 10 : i32, message = "bqk,bkd->bqd"}> : () -> ()
    %cst_20 = arith.constant dense<0.000000e+00> : vector<2x8x16xf32>
    %35 = tpu.matmul %34, %21, %cst_20 {dimension_numbers = #tpu.dot_dimension_numbers<[2], [1], [1], [2], [0, 0, 0, 1, 1, 2], [0], [0]>} : vector<2x8x8xbf16>, vector<2x8x16xbf16>, vector<2x8x16xf32> -> vector<2x8x16xf32>
    "tpu.trace_stop"() : () -> ()
    %36 = tpu.reciprocal %33 {approx = true} : vector<2x8x1xf32> -> vector<2x8x1xf32>
    %37 = vector.broadcast %36 : vector<2x8x1xf32> to vector<2x8x16xf32>
    %38 = arith.mulf %35, %37 : vector<2x8x16xf32>
    %39 = vector.shape_cast %38 : vector<2x8x16xf32> to vector<16x16xf32>
    %40 = arith.truncf %39 : vector<16x16xf32> to vector<16x16xbf16>
    %c0_21 = arith.constant 0 : index
    %c0_22 = arith.constant 0 : index
    %41 = vector.load %arg19[%c0_21, %c0_22] : memref<16x32xbf16, #tpu.memory_space<vmem>>, vector<16x16xbf16>
    tpu.vector_store %arg19[%c0_21, %c0_22], %40 {strides = array<i32>} : memref<16x32xbf16, #tpu.memory_space<vmem>>, vector<16x16xbf16>,
    %c0_23 = arith.constant 0 : index
    %c16 = arith.constant 16 : index
    %42 = vector.load %arg18[%c0_23, %c16] : memref<16x96xbf16, #tpu.memory_space<vmem>>, vector<16x16xbf16>
    %43 = vector.shape_cast %42 : vector<16x16xbf16> to vector<2x8x16xbf16>
    %c0_24 = arith.constant 0 : index
    %c48 = arith.constant 48 : index
    %44 = vector.load %arg18[%c0_24, %c48] : memref<16x96xbf16, #tpu.memory_space<vmem>>, vector<16x16xbf16>
    %45 = vector.shape_cast %44 : vector<16x16xbf16> to vector<2x8x16xbf16>
    %c0_25 = arith.constant 0 : index
    %c80 = arith.constant 80 : index
    %46 = vector.load %arg18[%c0_25, %c80] : memref<16x96xbf16, #tpu.memory_space<vmem>>, vector<16x16xbf16>
    %47 = vector.shape_cast %46 : vector<16x16xbf16> to vector<2x8x16xbf16>
    "tpu.trace_start"() <{level = 10 : i32, message = "bqd,bkd->bqk"}> : () -> ()
    %cst_26 = arith.constant dense<0.000000e+00> : vector<2x8x8xf32>
    %48 = tpu.matmul %43, %45, %cst_26 {dimension_numbers = #tpu.dot_dimension_numbers<[2], [2], [1], [1], [0, 0, 0, 1, 1, 1], [0], [0]>} : vector<2x8x16xbf16>, vector<2x8x16xbf16>, vector<2x8x8xf32> -> vector<2x8x8xf32>
    "tpu.trace_stop"() : () -> ()
    %cst_27 = arith.constant 2.500000e-01 : f32
    %49 = vector.broadcast %cst_27 : f32 to vector<2x8x8xf32>
    %50 = arith.mulf %48, %49 : vector<2x8x8xf32>
    %51 = vector.broadcast %15 : vector<2x1x8xf32> to vector<2x8x8xf32>
    %52 = arith.addf %50, %51 : vector<2x8x8xf32>
    %cst_28 = arith.constant dense<0xFF800000> : vector<2x8xf32>
    %53 = vector.multi_reduction <maximumf>, %52, %cst_28 [2] : vector<2x8x8xf32> to vector<2x8xf32>
    %54 = vector.shape_cast %53 : vector<2x8xf32> to vector<2x8x1xf32>
    %55 = vector.broadcast %54 : vector<2x8x1xf32> to vector<2x8x8xf32>
    %56 = arith.subf %52, %55 : vector<2x8x8xf32>
    %57 = math.exp %56 : vector<2x8x8xf32>
    %cst_29 = arith.constant dense<0.000000e+00> : vector<2x8xf32>
    %58 = vector.multi_reduction <add>, %57, %cst_29 [2] : vector<2x8x8xf32> to vector<2x8xf32>
    %59 = vector.shape_cast %58 : vector<2x8xf32> to vector<2x8x1xf32>
    %60 = arith.truncf %57 : vector<2x8x8xf32> to vector<2x8x8xbf16>
    "tpu.trace_start"() <{level = 10 : i32, message = "bqk,bkd->bqd"}> : () -> ()
    %cst_30 = arith.constant dense<0.000000e+00> : vector<2x8x16xf32>
    %61 = tpu.matmul %60, %47, %cst_30 {dimension_numbers = #tpu.dot_dimension_numbers<[2], [1], [1], [2], [0, 0, 0, 1, 1, 2], [0], [0]>} : vector<2x8x8xbf16>, vector<2x8x16xbf16>, vector<2x8x16xf32> -> vector<2x8x16xf32>
    "tpu.trace_stop"() : () -> ()
    %62 = tpu.reciprocal %59 {approx = true} : vector<2x8x1xf32> -> vector<2x8x1xf32>
    %63 = vector.broadcast %62 : vector<2x8x1xf32> to vector<2x8x16xf32>
    %64 = arith.mulf %61, %63 : vector<2x8x16xf32>
    %65 = vector.shape_cast %64 : vector<2x8x16xf32> to vector<16x16xf32>
    %66 = arith.truncf %65 : vector<16x16xf32> to vector<16x16xbf16>
    %c0_31 = arith.constant 0 : index
    %c16_32 = arith.constant 16 : index
    %67 = vector.load %arg19[%c0_31, %c16_32] : memref<16x32xbf16, #tpu.memory_space<vmem>>, vector<16x16xbf16>
    tpu.vector_store %arg19[%c0_31, %c16_32], %66 {strides = array<i32>} : memref<16x32xbf16, #tpu.memory_space<vmem>>, vector<16x16xbf16>,
    %c0_33 = arith.constant 0 : index
    %c0_34 = arith.constant 0 : index
    %68 = vector.load %arg19[%c0_33, %c0_34] : memref<16x32xbf16, #tpu.memory_space<vmem>>, vector<16x32xbf16>
    %c0_35 = arith.constant 0 : index
    %c0_36 = arith.constant 0 : index
    %c0_37 = arith.constant 0 : index
    %69 = vector.load %arg6[%c0_35, %c0_36, %c0_37] : memref<1x32x32xbf16, #tpu.memory_space<vmem>>, vector<1x32x32xbf16>
    %70 = vector.shape_cast %69 : vector<1x32x32xbf16> to vector<32x32xbf16>
    %cst_38 = arith.constant dense<0.000000e+00> : vector<16x32xf32>
    %71 = tpu.matmul %68, %70, %cst_38 {dimension_numbers = #tpu.dot_dimension_numbers<[1], [0], [0], [1], [0, 0, 1, 1], [], []>} : vector<16x32xbf16>, vector<32x32xbf16>, vector<16x32xf32> -> vector<16x32xf32>
    %c0_39 = arith.constant 0 : index
    %c0_40 = arith.constant 0 : index
    %c0_41 = arith.constant 0 : index
    %72 = vector.load %arg7[%c0_39, %c0_40, %c0_41] : memref<1x1x32xf32, #tpu.memory_space<vmem>>, vector<1x1x32xf32>
    %73 = vector.shape_cast %72 : vector<1x1x32xf32> to vector<1x32xf32>
    %74 = vector.broadcast %73 : vector<1x32xf32> to vector<16x32xf32>
    %75 = arith.addf %71, %74 : vector<16x32xf32>
    %76 = arith.addf %75, %3 : vector<16x32xf32>
    %c0_42 = arith.constant 0 : index
    %c0_43 = arith.constant 0 : index
    %c0_44 = arith.constant 0 : index
    %77 = vector.load %arg8[%c0_42, %c0_43, %c0_44] : memref<1x1x32xf32, #tpu.memory_space<vmem>>, vector<1x1x32xf32>
    %78 = vector.shape_cast %77 : vector<1x1x32xf32> to vector<1x32xf32>
    %c0_45 = arith.constant 0 : index
    %c0_46 = arith.constant 0 : index
    %c0_47 = arith.constant 0 : index
    %79 = vector.load %arg9[%c0_45, %c0_46, %c0_47] : memref<1x1x32xf32, #tpu.memory_space<vmem>>, vector<1x1x32xf32>
    %80 = vector.shape_cast %79 : vector<1x1x32xf32> to vector<1x32xf32>
    %cst_48 = arith.constant dense<0.000000e+00> : vector<16xf32>
    %81 = vector.multi_reduction <add>, %76, %cst_48 [1] : vector<16x32xf32> to vector<16xf32>
    %82 = vector.shape_cast %81 : vector<16xf32> to vector<16x1xf32>
    %cst_49 = arith.constant 3.200000e+01 : f32
    %83 = vector.broadcast %cst_49 : f32 to vector<16x1xf32>
    %84 = arith.divf %82, %83 : vector<16x1xf32>
    %85 = vector.broadcast %84 : vector<16x1xf32> to vector<16x32xf32>
    %86 = arith.subf %76, %85 : vector<16x32xf32>
    %87 = arith.mulf %86, %86 : vector<16x32xf32>
    %cst_50 = arith.constant dense<0.000000e+00> : vector<16xf32>
    %88 = vector.multi_reduction <add>, %87, %cst_50 [1] : vector<16x32xf32> to vector<16xf32>
    %89 = vector.shape_cast %88 : vector<16xf32> to vector<16x1xf32>
    %cst_51 = arith.constant 3.200000e+01 : f32
    %90 = vector.broadcast %cst_51 : f32 to vector<16x1xf32>
    %91 = arith.divf %89, %90 : vector<16x1xf32>
    %92 = vector.broadcast %84 : vector<16x1xf32> to vector<16x32xf32>
    %93 = arith.subf %76, %92 : vector<16x32xf32>
    %cst_52 = arith.constant 9.99999996E-13 : f32
    %94 = vector.broadcast %cst_52 : f32 to vector<16x1xf32>
    %95 = arith.addf %91, %94 : vector<16x1xf32>
    %96 = math.rsqrt %95 : vector<16x1xf32>
    %97 = vector.broadcast %96 : vector<16x1xf32> to vector<16x32xf32>
    %98 = arith.mulf %93, %97 : vector<16x32xf32>
    %99 = vector.broadcast %78 : vector<1x32xf32> to vector<16x32xf32>
    %100 = arith.mulf %98, %99 : vector<16x32xf32>
    %101 = vector.broadcast %80 : vector<1x32xf32> to vector<16x32xf32>
    %102 = arith.addf %100, %101 : vector<16x32xf32>
    %103 = arith.truncf %102 : vector<16x32xf32> to vector<16x32xbf16>
    %c0_53 = arith.constant 0 : index
    %c0_54 = arith.constant 0 : index
    %c0_55 = arith.constant 0 : index
    %104 = vector.load %arg10[%c0_53, %c0_54, %c0_55] : memref<1x32x64xbf16, #tpu.memory_space<vmem>>, vector<1x32x64xbf16>
    %105 = vector.shape_cast %104 : vector<1x32x64xbf16> to vector<32x64xbf16>
    %cst_56 = arith.constant dense<0.000000e+00> : vector<16x64xf32>
    %106 = tpu.matmul %103, %105, %cst_56 {dimension_numbers = #tpu.dot_dimension_numbers<[1], [0], [0], [1], [0, 0, 1, 1], [], []>} : vector<16x32xbf16>, vector<32x64xbf16>, vector<16x64xf32> -> vector<16x64xf32>
    %c0_57 = arith.constant 0 : index
    %c0_58 = arith.constant 0 : index
    %c0_59 = arith.constant 0 : index
    %107 = vector.load %arg11[%c0_57, %c0_58, %c0_59] : memref<1x1x64xf32, #tpu.memory_space<vmem>>, vector<1x1x64xf32>
    %108 = vector.shape_cast %107 : vector<1x1x64xf32> to vector<1x64xf32>
    %109 = vector.broadcast %108 : vector<1x64xf32> to vector<16x64xf32>
    %110 = arith.addf %106, %109 : vector<16x64xf32>
    %111 = arith.mulf %110, %110 : vector<16x64xf32>
    %112 = arith.mulf %110, %111 : vector<16x64xf32>
    %cst_60 = arith.constant 4.471500e-02 : f32
    %113 = vector.broadcast %cst_60 : f32 to vector<16x64xf32>
    %114 = arith.mulf %113, %112 : vector<16x64xf32>
    %115 = arith.addf %110, %114 : vector<16x64xf32>
    %cst_61 = arith.constant 0.797884583 : f32
    %116 = vector.broadcast %cst_61 : f32 to vector<16x64xf32>
    %117 = arith.mulf %116, %115 : vector<16x64xf32>
    %cst_62 = arith.constant 5.000000e-01 : f32
    %118 = vector.broadcast %cst_62 : f32 to vector<16x64xf32>
    %119 = arith.mulf %118, %110 : vector<16x64xf32>
    %120 = math.tanh %117 : vector<16x64xf32>
    %cst_63 = arith.constant 1.000000e+00 : f32
    %121 = vector.broadcast %cst_63 : f32 to vector<16x64xf32>
    %122 = arith.addf %121, %120 : vector<16x64xf32>
    %123 = arith.mulf %119, %122 : vector<16x64xf32>
    %124 = arith.truncf %123 : vector<16x64xf32> to vector<16x64xbf16>
    %c0_64 = arith.constant 0 : index
    %c0_65 = arith.constant 0 : index
    %c0_66 = arith.constant 0 : index
    %125 = vector.load %arg12[%c0_64, %c0_65, %c0_66] : memref<1x64x32xbf16, #tpu.memory_space<vmem>>, vector<1x64x32xbf16>
    %126 = vector.shape_cast %125 : vector<1x64x32xbf16> to vector<64x32xbf16>
    %cst_67 = arith.constant dense<0.000000e+00> : vector<16x32xf32>
    %127 = tpu.matmul %124, %126, %cst_67 {dimension_numbers = #tpu.dot_dimension_numbers<[1], [0], [0], [1], [0, 0, 1, 1], [], []>} : vector<16x64xbf16>, vector<64x32xbf16>, vector<16x32xf32> -> vector<16x32xf32>
    %c0_68 = arith.constant 0 : index
    %c0_69 = arith.constant 0 : index
    %c0_70 = arith.constant 0 : index
    %128 = vector.load %arg13[%c0_68, %c0_69, %c0_70] : memref<1x1x32xf32, #tpu.memory_space<vmem>>, vector<1x1x32xf32>
    %129 = vector.shape_cast %128 : vector<1x1x32xf32> to vector<1x32xf32>
    %130 = vector.broadcast %129 : vector<1x32xf32> to vector<16x32xf32>
    %131 = arith.addf %127, %130 : vector<16x32xf32>
    %132 = arith.addf %131, %102 : vector<16x32xf32>
    %c0_71 = arith.constant 0 : index
    %c0_72 = arith.constant 0 : index
    %c0_73 = arith.constant 0 : index
    %133 = vector.load %arg14[%c0_71, %c0_72, %c0_73] : memref<1x1x32xf32, #tpu.memory_space<vmem>>, vector<1x1x32xf32>
    %134 = vector.shape_cast %133 : vector<1x1x32xf32> to vector<1x32xf32>
    %c0_74 = arith.constant 0 : index
    %c0_75 = arith.constant 0 : index
    %c0_76 = arith.constant 0 : index
    %135 = vector.load %arg15[%c0_74, %c0_75, %c0_76] : memref<1x1x32xf32, #tpu.memory_space<vmem>>, vector<1x1x32xf32>
    %136 = vector.shape_cast %135 : vector<1x1x32xf32> to vector<1x32xf32>
    %cst_77 = arith.constant dense<0.000000e+00> : vector<16xf32>
    %137 = vector.multi_reduction <add>, %132, %cst_77 [1] : vector<16x32xf32> to vector<16xf32>
    %138 = vector.shape_cast %137 : vector<16xf32> to vector<16x1xf32>
    %cst_78 = arith.constant 3.200000e+01 : f32
    %139 = vector.broadcast %cst_78 : f32 to vector<16x1xf32>
    %140 = arith.divf %138, %139 : vector<16x1xf32>
    %141 = vector.broadcast %140 : vector<16x1xf32> to vector<16x32xf32>
    %142 = arith.subf %132, %141 : vector<16x32xf32>
    %143 = arith.mulf %142, %142 : vector<16x32xf32>
    %cst_79 = arith.constant dense<0.000000e+00> : vector<16xf32>
    %144 = vector.multi_reduction <add>, %143, %cst_79 [1] : vector<16x32xf32> to vector<16xf32>
    %145 = vector.shape_cast %144 : vector<16xf32> to vector<16x1xf32>
    %cst_80 = arith.constant 3.200000e+01 : f32
    %146 = vector.broadcast %cst_80 : f32 to vector<16x1xf32>
    %147 = arith.divf %145, %146 : vector<16x1xf32>
    %148 = vector.broadcast %140 : vector<16x1xf32> to vector<16x32xf32>
    %149 = arith.subf %132, %148 : vector<16x32xf32>
    %cst_81 = arith.constant 9.99999996E-13 : f32
    %150 = vector.broadcast %cst_81 : f32 to vector<16x1xf32>
    %151 = arith.addf %147, %150 : vector<16x1xf32>
    %152 = math.rsqrt %151 : vector<16x1xf32>
    %153 = vector.broadcast %152 : vector<16x1xf32> to vector<16x32xf32>
    %154 = arith.mulf %149, %153 : vector<16x32xf32>
    %155 = vector.broadcast %134 : vector<1x32xf32> to vector<16x32xf32>
    %156 = arith.mulf %154, %155 : vector<16x32xf32>
    %157 = vector.broadcast %136 : vector<1x32xf32> to vector<16x32xf32>
    %158 = arith.addf %156, %157 : vector<16x32xf32>
    %c0_82 = arith.constant 0 : index
    %c0_83 = arith.constant 0 : index
    %159 = vector.load %arg17[%c0_82, %c0_83] : memref<16x32xf32, #tpu.memory_space<vmem>>, vector<16x32xf32>
    tpu.vector_store %arg17[%c0_82, %c0_83], %158 {strides = array<i32>} : memref<16x32xf32, #tpu.memory_space<vmem>>, vector<16x32xf32>,
    %c1_i32 = arith.constant 1 : i32
    %160 = arith.cmpi eq, %arg1, %c1_i32 : i32
    %161 = arith.extui %160 : i1 to i32
    %c0_i32_84 = arith.constant 0 : i32
    %162 = arith.cmpi ne, %161, %c0_i32_84 : i32
    scf.if %162 {
      %c0_85 = arith.constant 0 : index
      %c0_86 = arith.constant 0 : index
      %163 = tpu.strided_load %arg17[%c0_85, %c0_86] {strides = array<i32: 8, 1>} : memref<16x32xf32, #tpu.memory_space<vmem>>, vector<2x32xf32>
      %c0_87 = arith.constant 0 : index
      %c0_88 = arith.constant 0 : index
      %164 = vector.load %arg16[%c0_87, %c0_88] : memref<2x32xf32, #tpu.memory_space<vmem>>, vector<2x32xf32>
      tpu.vector_store %arg16[%c0_87, %c0_88], %163 {strides = array<i32>} : memref<2x32xf32, #tpu.memory_space<vmem>>, vector<2x32xf32>,
    } else {
    }
    return
  }
  func.func @transform_1(%arg0: i32, %arg1: i32) -> (i32, i32) {
    %c0_i32 = arith.constant 0 : i32
    %c0_i32_0 = arith.constant 0 : i32
    return %arg0, %c0_i32 : i32, i32
  }
  func.func @transform_2(%arg0: i32, %arg1: i32) -> (i32, i32, i32) {
    %c0_i32 = arith.constant 0 : i32
    %c0_i32_0 = arith.constant 0 : i32
    %c0_i32_1 = arith.constant 0 : i32
    return %arg1, %c0_i32, %c0_i32_0 : i32, i32, i32
  }
  func.func @transform_3(%arg0: i32, %arg1: i32) -> (i32, i32, i32) {
    %c0_i32 = arith.constant 0 : i32
    %c0_i32_0 = arith.constant 0 : i32
    %c0_i32_1 = arith.constant 0 : i32
    return %arg1, %c0_i32, %c0_i32_0 : i32, i32, i32
  }
  func.func @transform_4(%arg0: i32, %arg1: i32) -> (i32, i32, i32) {
    %c0_i32 = arith.constant 0 : i32
    %c0_i32_0 = arith.constant 0 : i32
    %c0_i32_1 = arith.constant 0 : i32
    return %arg1, %c0_i32, %c0_i32_0 : i32, i32, i32
  }
  func.func @transform_5(%arg0: i32, %arg1: i32) -> (i32, i32, i32) {
    %c0_i32 = arith.constant 0 : i32
    %c0_i32_0 = arith.constant 0 : i32
    %c0_i32_1 = arith.constant 0 : i32
    return %arg1, %c0_i32, %c0_i32_0 : i32, i32, i32
  }
  func.func @transform_6(%arg0: i32, %arg1: i32) -> (i32, i32, i32) {
    %c0_i32 = arith.constant 0 : i32
    %c0_i32_0 = arith.constant 0 : i32
    %c0_i32_1 = arith.constant 0 : i32
    return %arg1, %c0_i32, %c0_i32_0 : i32, i32, i32
  }
  func.func @transform_7(%arg0: i32, %arg1: i32) -> (i32, i32, i32) {
    %c0_i32 = arith.constant 0 : i32
    %c0_i32_0 = arith.constant 0 : i32
    %c0_i32_1 = arith.constant 0 : i32
    return %arg1, %c0_i32, %c0_i32_0 : i32, i32, i32
  }
  func.func @transform_8(%arg0: i32, %arg1: i32) -> (i32, i32, i32) {
    %c0_i32 = arith.constant 0 : i32
    %c0_i32_0 = arith.constant 0 : i32
    %c0_i32_1 = arith.constant 0 : i32
    return %arg1, %c0_i32, %c0_i32_0 : i32, i32, i32
  }
  func.func @transform_9(%arg0: i32, %arg1: i32) -> (i32, i32, i32) {
    %c0_i32 = arith.constant 0 : i32
    %c0_i32_0 = arith.constant 0 : i32
    %c0_i32_1 = arith.constant 0 : i32
    return %arg1, %c0_i32, %c0_i32_0 : i32, i32, i32
  }
  func.func @transform_10(%arg0: i32, %arg1: i32) -> (i32, i32, i32) {
    %c0_i32 = arith.constant 0 : i32
    %c0_i32_0 = arith.constant 0 : i32
    %c0_i32_1 = arith.constant 0 : i32
    return %arg1, %c0_i32, %c0_i32_0 : i32, i32, i32
  }
  func.func @transform_11(%arg0: i32, %arg1: i32) -> (i32, i32, i32) {
    %c0_i32 = arith.constant 0 : i32
    %c0_i32_0 = arith.constant 0 : i32
    %c0_i32_1 = arith.constant 0 : i32
    return %arg1, %c0_i32, %c0_i32_0 : i32, i32, i32
  }
  func.func @transform_12(%arg0: i32, %arg1: i32) -> (i32, i32, i32) {
    %c0_i32 = arith.constant 0 : i32
    %c0_i32_0 = arith.constant 0 : i32
    %c0_i32_1 = arith.constant 0 : i32
    return %arg1, %c0_i32, %c0_i32_0 : i32, i32, i32
  }
  func.func @transform_13(%arg0: i32, %arg1: i32) -> (i32, i32, i32) {
    %c0_i32 = arith.constant 0 : i32
    %c0_i32_0 = arith.constant 0 : i32
    %c0_i32_1 = arith.constant 0 : i32
    return %arg1, %c0_i32, %c0_i32_0 : i32, i32, i32
  }
  func.func @transform_14(%arg0: i32, %arg1: i32) -> (i32, i32) {
    %c0_i32 = arith.constant 0 : i32
    %c0_i32_0 = arith.constant 0 : i32
    return %arg0, %c0_i32 : i32, i32
  }
}

</mosaic_0001>

<bundles_post_ra>
// kernel: tpu_custom_call.1
= control target key start
LH: loop header
LB: loop body
LE: loop exit
PB: predicated region body
PF: predicated region fallthrough
CT: control target
= control target key end

     0   :  { %s2407_s0 = inlined_call_operand.hbm [shape: f32[16,32], index: 0, kind: input, shape index: {}]   ;;  %s2408_s1 = inlined_call_operand.hbm [shape: f32[2,8], index: 1, kind: input, shape index: {}]   ;;  %s2409_s2 = inlined_call_operand.vmem [shape: bf16[2,32,96], index: 2, kind: input, shape index: {}]   ;;  %s2410_s3 = inlined_call_operand.hbm [shape: f32[2,1,96], index: 3, kind: input, shape index: {}]   ;;  %s2411_s4 = inlined_call_operand.vmem [shape: bf16[2,32,32], index: 4, kind: input, shape index: {}]   ;;  %s2412_s5 = inlined_call_operand.vmem [shape: f32[2,1,32], index: 5, kind: input, shape index: {}]   ;;  %s2413_s6 = inlined_call_operand.vmem [shape: f32[2,1,32], index: 6, kind: input, shape index: {}]   ;;  %s2414_s7 = inlined_call_operand.hbm [shape: f32[2,1,32], index: 7, kind: input, shape index: {}]   ;;  %s2415_s8 = inlined_call_operand.vmem [shape: bf16[2,32,64], index: 8, kind: input, shape index: {}]   ;;  %s2416_s9 = inlined_call_operand.vmem [shape: f32[2,1,64], index: 9, kind: input, shape index: {}]   ;;  %s2417_s10 = inlined_call_operand.vmem [shape: bf16[2,64,32], index: 10, kind: input, shape index: {}]   ;;  %s2418_s11 = inlined_call_operand.vmem [shape: f32[2,1,32], index: 11, kind: input, shape index: {}]   ;;  %s2419_s12 = inlined_call_operand.vmem [shape: f32[2,1,32], index: 12, kind: input, shape index: {}]   ;;  %s2420_s13 = inlined_call_operand.hbm [shape: f32[2,1,32], index: 13, kind: input, shape index: {}]   ;;  %s2421_s14 = inlined_call_operand.hbm [shape: f32[2,32], index: 14, kind: output, shape index: {}]  }
   0x1   :  { %2430 = sst [smem:[#allocation30_spill]] %s2407_s0 }
   0x2   :  { %2431 = sst [smem:[#allocation31_spill]] %s2408_s1 }
   0x3   :  { %2432 = sst [smem:[#allocation32_spill]] %s2409_s2 }
   0x4   :  { %2433 = sst [smem:[#allocation33_spill]] %s2410_s3 }
   0x5   :  { %2434 = sst [smem:[#allocation34_spill]] %s2411_s4 }
   0x6   :  { %2435 = sst [smem:[#allocation35_spill]] %s2414_s7 }
   0x7   :  { %2436 = sst [smem:[#allocation36_spill]] %s2416_s9 }
   0x8   :  { %2437 = sst [smem:[#allocation37_spill]] %s2417_s10 }
   0x9   :  { %2438 = sst [smem:[#allocation38_spill]] %s2418_s11 }
   0xa   :  { %2439 = sst [smem:[#allocation39_spill]] %s2419_s12 }
   0xb   :  { %2440 = sst [smem:[#allocation40_spill]] %s2420_s13 }
   0xc   :  { %2441 = sst [smem:[#allocation41_spill]] %s2421_s14 }
   0xd   :  { %19 = vsyncpa [#allocation7], 0 }
   0xe   :  { %20 = vsyncpa [#allocation10], 0 }
   0xf   :  { %22 = vsyncpa [#allocation10 + $0x1], 0 }
  0x10   :  { %23 = vsyncpa [#allocation13], 0 }
  0x11   :  { %25 = vsyncpa [#allocation13 + $0x1], 0 }
  0x12   :  { %26 = vsyncpa [#allocation8], 0  ;;  %s2103_s29 = smov 0   ;;  %s2105_s30 = smov 0  }
  0x13   :  { %s2107_s15 = smov 0   ;;  %s2109_s16 = smov 0  }
  0x14   :  { %s2111_s17 = smov 0   ;;  %s2113_s18 = smov 0  }
  0x15 LB: > { %2442 = sst [smem:[#allocation24_spill]] %s2004_s15  ;;  %s41_s19 = sadd.s32 1, %s2012_s17  ;;  %s2016_s18 = sphi %s2113_s18, %s32_s18   ;;  %s2012_s17 = sphi %s2111_s17, %s2475_s17   ;;  %s2008_s16 = sphi %s2109_s16, %s2474_s16   ;;  %s2004_s15 = sphi %s2107_s15, %s2473_s15   ;;  %s2000_s30 = sphi %s2105_s30, %s2477_s30   ;;  %s1996_s29 = sphi %s2103_s29, %s2476_s29  }
  0x16   : > { %2443 = sst [smem:[#allocation25_spill]] %s2012_s17  ;;  %s103_s20 = sadd.s32 1, %s2004_s15 }
  0x17   : > { %2444 = sst [smem:[#allocation26_spill]] %s2016_s18  ;;  %p42_p0 = scmp.ge.s32.totalorder %s41_s19, 2 }
  0x18   : > { %p110_p1 = scmp.ne.s32.totalorder %s2004_s15, %s2000_s30  ;;  %p111_p2 = scmp.eq.s32.totalorder %s2016_s18, 0 }
  0x19   : > { %s2479_s19 = smov (%p42_p0, %s41_s19), 0  ;;  %p1673_p4 = scmp.lt.s32.totalorder %s2016_s18, 2 }
  0x1a   : > { %2445 = sst [smem:[#allocation27_spill]] %s2479_s19  ;;  %p2140_p3 = por %p111_p2, %p110_p1 }
  0x1b   : > { %s100_s22 = ssub.s32 %s2012_s17, %s2479_s19  ;;  %s448_s23 = sand.u32 1, %s2016_s18  }
  0x1c   : > { %p101_p5 = scmp.eq.s32.totalorder %s100_s22, 0  ;;  %s2149_s24 = sand.u32 1, %s2004_s15  }
  0x1d   : > { %s2447_s3 = sld [smem:[#allocation33_spill]]  ;;  %s451_s12 = scalar_lea.vmem [#allocation9], %s2149_s24 }
  0x1e   : > { %s2156_s28 = scalar_select %p101_p5, %s2004_s15, %s103_s20  }
  0x1f   : > { %s458_s11 = sshll.u32 %s451_s12, 4  ;;  %p2161_p6 = pnand %p1673_p4, %p2140_p3  ;;  %s459_s11 = int_to_ptr.vmem [resolvable:$true] %s458_s11 }
  0x20   : > { %2448 = sst [smem:[#allocation28_spill]] %s2156_s28  ;;  %s449_s22 = scalar_lea.sflag [#allocation10], %s448_s23 }
  0x21   : > { %s2168_s25 = sadd.s32 4294967295, %s2016_s18   ;;  %p116_p7 = scmp.ne.s32.totalorder %s2000_s30, %s1996_s29 }
  0x22   : > { %2450 = sst [smem:[#allocation29_spill]] %s2168_s25  ;;  %p117_p8 = scmp.eq.s32.totalorder %s2168_s25, 0 }
  0x23   : > { %s454_s27 = scalar_lea.hbm %s2447_s3, %s2012_s17  ;;  %p1546_p9 = scmp.ge.s32.totalorder %s2016_s18, 1 }
  0x24   : > { %s456_s14 = sshll.u32 %s454_s27, 4  ;;  %p413_p10 = scmp.lt.s32.totalorder %s2016_s18, 3  ;;  %s457_s14 = int_to_ptr.hbm [resolvable:$true] %s456_s14 }
  0x25   : > { %1665 = dma.hbm_to_vmem [thread:$0]  (!%p2161_p6), %s457_s14, 16, %s459_s11, %s449_s22  }
  0x26   : > { %p2177_p11 = por %p117_p8, %p116_p7  ;;  %p2181_p12 = pnand %p1546_p9, %p413_p10 }
  0x27   : > { %s2453_s1 = sld [smem:[#allocation31_spill]]  ;;  %s2018_s29 = smov [#allocation6]  }
  0x28   : > { %p1658_p13 = pneg %p2181_p12  ;;  %s429_s23 = sshll.u32 %s2018_s29, 4  ;;  %s430_s23 = int_to_ptr.vmem [resolvable:$true] %s429_s23 }
  0x29   : > { %s2454_s7 = sld [smem:[#allocation35_spill]]  ;;  %s488_s11 = scalar_lea.vmem [#allocation11], %s2149_s24 }
  0x2a   : > { %p1659_p0 = pnand %p1658_p13, %p117_p8  ;;  %s495_s14 = sshll.u32 %s488_s11, 4  ;;  %s496_s14 = int_to_ptr.vmem [resolvable:$true] %s495_s14 }
  0x2b   : > { %s2455_s13 = sld [smem:[#allocation40_spill]]  ;;  %s539_s10 = scalar_lea.vmem [#allocation12], %s2149_s24 }
  0x2c   : > { %s546_s9 = sshll.u32 %s539_s10, 4  ;;  %s537_s26 = scalar_lea.sflag [#allocation13], %s2149_s24  ;;  %s547_s9 = int_to_ptr.vmem [resolvable:$true] %s546_s9 }
  0x2d   : > { %s427_s21 = sshll.u32 %s2453_s1, 4  ;;  %s428_s21 = int_to_ptr.hbm [resolvable:$true] %s427_s21 }
  0x2e   : > { %1661 = dma.hbm_to_vmem [thread:$0]  (!%p1659_p0), %s428_s21, 32, %s430_s23, [#allocation7]  }
  0x2f   : > { %s491_s3 = scalar_lea.hbm %s2454_s7, %s2012_s17 }
  0x30   : > { %s493_s28 = sshll.u32 %s491_s3, 4  ;;  %555 = sbr.rel (%p2181_p12) target bundleno = 1899 (0x76b), region = 72  ;;  %s494_s28 = int_to_ptr.hbm [resolvable:$true] %s493_s28 }
  0x31   : > { %1668 = dma.hbm_to_vmem [thread:$0]  (!%p2161_p6), %s494_s28, 16, %s496_s14, %s449_s22  }
  0x32   : > { %s542_s29 = scalar_lea.hbm %s2455_s13, %s2012_s17 }
  0x33   : > { %s544_s18 = sshll.u32 %s542_s29, 4  ;;  %s545_s18 = int_to_ptr.hbm [resolvable:$true] %s544_s18 }
  0x34   : > { %1671 = dma.hbm_to_vmem [thread:$0]  (!%p2161_p6), %s545_s18, 16, %s547_s9, %s537_s26  }
  0x35   : > { %1975 = dma.done.wait (%p117_p8), [#allocation7], 32  }
  0x36   : > { %1977 = vsyncadd (%p117_p8), [#allocation7], 4294967264  ;;  %s562_s1 = sand.u32 1, %s2168_s25   ;;  %s2215_s3 = sand.u32 1, %s2000_s30  }
  0x37   : > { %s563_s10 = scalar_lea.sflag [#allocation10], %s562_s1 }
  0x38   : > { %1979 = dma.done.wait (%p2177_p11), %s563_s10, 32  }
  0x39   : > { %1981 = vsyncadd (%p2177_p11), %s563_s10, 4294967264  ;;  %s581_s18 = scalar_lea.sflag [#allocation13], %s2215_s3 }
  0x3a   : > { %1983 = dma.done.wait (%p2177_p11), %s581_s18, 16  }
  0x3b   : > { %1985 = vsyncadd (%p2177_p11), %s581_s18, 4294967280  ;;  %p664_p1 = scmp.lt.s32.totalorder %s2008_s16, 1  ;;  %p1675_p2 = scmp.eq.s32.totalorder %s2008_s16, 0 }
  0x3c   : > { %s2456_s0 = sld [smem:[#allocation30_spill]]  ;;  %s2019_s19 = smov [#allocation2]  }
  0x3d   : > { %s2235_s20 = scalar_select %p664_p1, %s2008_s16, 1 }
  0x3e   : > { %s2457_s2 = sld [smem:[#allocation32_spill]] }
  0x3f   : > { %s1622_s12 = sshll.u32 %s2235_s20, 4  ;;  %s2458_s4 = sld [smem:[#allocation34_spill]] }
  0x40   : > { %s2257_s15 = scalar_lea.vmem %s2415_s8, %s1622_s12  ;;  %s2459_s27 = sld [smem:[#allocation36_spill]] }
  0x41   : > { %s1625_s11 = sshll.u32 %s2235_s20, 5  ;;  %s2460_s7 = sld [smem:[#allocation37_spill]] }
  0x42   : > { %s713_s22 = sshll.u32 %s2456_s0, 4  ;;  %s2461_s13 = sld [smem:[#allocation38_spill]]  ;;  %s714_s22 = int_to_ptr.hbm [resolvable:$true] %s713_s22 }
  0x43   : > { %s2462_s17 = sld [smem:[#allocation39_spill]] }
  0x44   : > { %s668_s29 = scalar_lea.vmem %s2457_s2, %s1622_s12 }
  0x45   : > { %s2248_s10 = scalar_lea.vmem %s2458_s4, %s1622_s12  ;;  %s715_s12 = sshll.u32 %s2019_s19, 4  ;;  %s716_s12 = int_to_ptr.vmem [resolvable:$true] %s715_s12 }
  0x46   : > { %s687_s0 = scalar_lea.vmem %s2459_s27, %s2235_s20 }
  0x47   : > { %s2267_s26 = scalar_lea.vmem %s2460_s7, %s1625_s11 }
  0x48   : > { %s695_s18 = scalar_lea.vmem %s2461_s13, %s2235_s20 }
  0x49   : > { %s698_s9 = scalar_lea.vmem %s2462_s17, %s2235_s20 }
  0x4a   : > { %1652 = dma.hbm_to_vmem [thread:$0]  (%p1675_p2), %s714_s22, 256, %s716_s12, [#allocation5] }
  0x4b   : > { %1987 = dma.done.wait (%p1675_p2), [#allocation5], 256 }
  0x4c   : > { %1989 = vsyncadd (%p1675_p2), [#allocation5], 4294967040  ;;  %v1627_v0 = vld [vmem:[%s668_s29 + $0x8] sm:$0xff]  ;;  %v1626_v1 = vld [vmem:[%s668_s29] sm:$0xff]  ;;  %vm745_vm0 = vcmask 261120   ;;  %s2464_s2 = scalar_lea.vmem [#allocation9], %s2215_s3  ;;  %s2465_s11 = scalar_lea.vmem %s2412_s5, %s2235_s20 }
  0x4d   : > { %v2283_v2 = vld [vmem:[#allocation2] sm:$0xff]  ;;  %v2285_v3 = vld [vmem:[#allocation2 + $0x8] sm:$0xff]  ;;  %755 = vmatpush.bf16.msra.mxu0 %v1627_v0  ;;  %vm765_vm1 = vcmask 781312   ;;  %s2020_s4 = smov 96   ;;  %s2021_s7 = smov 112   ;;  %vm778_vm2 = vcmask 130048  }
  0x4e   : > { %v724_v4 = vpack.c.bf16 %v2285_v3, %v2283_v2  ;;  %v1736_v5 = vld [vmem:[%s2464_s2] ss:$0 sm:$0xff]  ;;  %s2022_s17 = smov 80   ;;  %s2023_s22 = smov 64   ;;  %vm856_vm3 = vcmask 1043456   ;;  %vm830_vm4 = vcmask 64512  }
  0x4f   : > { %v768_v37 = vld [vmem:[#allocation6] sm:$0x3]  ;;  %s2024_s29 = smov 48   ;;  %vm900_vm5 = vcmask 125952   ;;  %s2025_s28 = smov 16   ;;  %vm1037_vm6 = vcmask 257152  }
  0x50   : > { %v824_v38 = vperm.slane %v768_v37, 0  ;;  %v770_v46 = vrot.slane %v768_v37, 1  ;;  %s2466_s14 = scalar_lea.vmem %s2413_s6, %s2235_s20  ;;  %s2467_s1 = scalar_lea.vmem [#allocation11], %s2215_s3  ;;  %vm1242_vm14 = vcmask 523264  }
  0x51   : > { %756 = vmatpush.bf16.msra.mxu0 %v1626_v1  ;;  %s2468_s2 = scalar_lea.vmem [#allocation12], %s2215_s3  ;;  %p1616_p3 = scmp.ne.s32.totalorder %s2008_s16, 1 }
  0x52   : > { %v825_v49 = vperm.slane %v770_v46, 0 }
  0x54   : > { %1568 = vmatmul.msk.bf16.vlgmr.msra.gmra.mxu0 %vm745_vm0, %v724_v4 }
  0xd1   : > { %v758_v6 = vpop.f32.mrf.mxu0 }
  0xd2   : > { %v759_v7 = vadd.f32 %v1736_v5, %v758_v6 }
  0xd4   : > { %v763_v8 = vpack.c.bf16 %v759_v7, %v759_v7 }
  0xd6   : > { %766 = vst.msk [vmem:[#allocation3] sm:$0xf] %vm765_vm1, %v763_v8 }
  0xd9   : > { %v760_v9 = vpop.f32.mrf.mxu0 }
  0xda   : > { %v761_v10 = vadd.f32 %v1736_v5, %v760_v9 }
  0xdc   : > { %v764_v11 = vpack.c.bf16 %v761_v10, %v761_v10 }
  0xdd   : > { %v771_v12 = vld [vmem:[#allocation3] sm:$0xf] }
  0xde   : > { %767 = vst.msk [vmem:[#allocation3 + $0x4] sm:$0xf] %vm765_vm1, %v764_v11  ;;  %v774_v13 = vunpack.c.l.b16 %v771_v12 }
  0xe0   : > { %v775_v14 = vpack.c.b16 %v774_v13, %v774_v13 }
  0xe2   : > { %776 = vrot.lane.b32.xlu0 %v775_v14, %s2020_s4 }
  0xe5   : > { %v1638_v15 = vld [vmem:[#allocation3] sm:$0xff]  }
  0xe6   : > { %v772_v16 = vld [vmem:[#allocation3 + $0x4] sm:$0xf]  ;;  %v1639_v17 = vunpack.c.l.b16 %v1638_v15  ;;  %v1640_v21 = vunpack.c.h.b16 %v1638_v15 }
  0xe7   : > { %v799_v18 = vunpack.c.l.b16 %v772_v16 }
  0xe8   : > { %v2292_v19 = vpack.c.b16 %v1639_v17, %v1639_v17  ;;  %v933_v22 = vpack.c.b16 %v1640_v21, %v1640_v21 }
  0xe9   : > { %v800_v20 = vpack.c.b16 %v799_v18, %v799_v18 }
  0xea   : > { %908 = vrot.lane.b32.xlu2 %v2292_v19, %s2021_s7  ;;  %910 = vrot.lane.b32.xlu1 %v2292_v19, %s2022_s17 }
  0xeb   : > { %801 = vrot.lane.b32.xlu0 %v800_v20, %s2020_s4 }
  0xf2   : > { %934 = vrot.lane.b32.xlu2 %v933_v22, %s2021_s7  ;;  %936 = vrot.lane.b32.xlu1 %v933_v22, %s2022_s17 }
  0xfa   : > { %851 = vrot.lane.b32.xlu1 %v775_v14, %s2023_s22 }
 0x102   : > { %873 = vrot.lane.b32.xlu1 %v800_v20, %s2023_s22 }
 0x144   : > { %v909_v29 = vpop.permute.xlu2 %908 }
 0x14c   : > { %v935_v32 = vpop.permute.xlu2 %934 }
 0x154   : > { %v777_v23 = vpop.permute.xlu0 %776 }
 0x155   : > { %v783_v24 = vsel %vm778_vm2, %v777_v23, 0 }
 0x156   : > { %792 = vmatpush.bf16.xpose.msra.mxu1 %v783_v24 }
 0x15c   : > { %v911_v25 = vpop.permute.xlu1 %910 }
 0x15d   : > { %v802_v26 = vpop.permute.xlu0 %801  ;;  %1569 = vmatmul.msk.bf16.vlgmr.msra.gmra.mxu1 %vm778_vm2, %v771_v12  ;;  %v916_v27 = vsel %vm778_vm2, %v911_v25, 0 }
 0x15e   : > { %v807_v28 = vsel %vm778_vm2, %v802_v26, 0  ;;  %925 = vmatpush.bf16.xpose.msrb.mxu0 %v916_v27 }
 0x15f   : > { %816 = vmatpush.bf16.xpose.msra.mxu2 %v807_v28 }
 0x164   : > { %v937_v30 = vpop.permute.xlu1 %936 }
 0x165   : > { %1573 = vmatmul.msk.bf16.vlgmr.msrb.gmra.mxu0 %vm778_vm2, %v909_v29  ;;  %v942_v31 = vsel %vm778_vm2, %v937_v30, 0 }
 0x166   : > { %1570 = vmatmul.msk.bf16.vlgmr.msra.gmra.mxu2 %vm778_vm2, %v772_v16  ;;  %951 = vmatpush.bf16.xpose.msrb.mxu1 %v942_v31 }
 0x16c   : > { %v852_v33 = vpop.permute.xlu1 %851 }
 0x16d   : > { %1574 = vmatmul.msk.bf16.vlgmr.msrb.gmra.mxu1 %vm778_vm2, %v935_v32  ;;  %v858_v34 = vsel %vm856_vm3, %v852_v33, 0 }
 0x16e   : > { %867 = vmatpush.bf16.msra.mxu3 %v858_v34 }
 0x174   : > { %v874_v35 = vpop.permute.xlu1 %873 }
 0x175   : > { %v879_v36 = vsel %vm856_vm3, %v874_v35, 0 }
 0x176   : > { %888 = vmatpush.bf16.msrb.mxu3 %v879_v36 }
 0x1da   : > { %v794_v39 = vpop.f32.mrf.mxu1 }
 0x1db   : > { %v822_v40 = vmul.f32 0.25, %v794_v39 }
 0x1dd   : > { %v828_v41 = vadd.f32 %v824_v38, %v822_v40 }
 0x1df   : > { %v831_v42 = vsel %vm830_vm4, %v828_v41, -inf }
 0x1e0   : > { %832 = vmax.xlane.f32.xlu0 %v831_v42 }
 0x1e2   : > { %v796_v43 = vpop.f32.mrf.mxu1  ;;  %v927_v44 = vpop.f32.mrf.mxu0 }
 0x1e3   : > { %v957_v45 = vmul.f32 0.25, %v927_v44 }
 0x1e5   : > { %v959_v47 = vadd.f32 %v957_v45, %v824_v38 }
 0x1e7   : > { %v961_v48 = vsel %vm830_vm4, %v959_v47, -inf }
 0x1e8   : > { %962 = vmax.xlane.f32.xlu1 %v961_v48 }
 0x1e9   : > { %v818_v50 = vpop.f32.mrf.mxu2 }
 0x1ea   : > { %v823_v51 = vmul.f32 0.25, %v818_v50  ;;  %v929_v52 = vpop.f32.mrf.mxu0  ;;  %v953_v53 = vpop.f32.mrf.mxu1 }
 0x1eb   : > { %v958_v55 = vmul.f32 0.25, %v953_v53  ;;  %v1629_v52 = vld [vmem:[%s2248_s10] sm:$0xff] }
 0x1ec   : > { %v829_v54 = vadd.f32 %v825_v49, %v823_v51  ;;  %v1630_v51 = vld [vmem:[%s2248_s10 + $0x8] sm:$0xff] }
 0x1ed   : > { %v960_v59 = vadd.f32 %v958_v55, %v825_v49  ;;  %1076 = vmatpush.bf16.msra.mxu0 %v1630_v51  ;;  %v1634_v51 = vld [vmem:[%s2267_s26 + $0x8] sm:$0xff] }
 0x1ee   : > { %v834_v56 = vsel %vm830_vm4, %v829_v54, -inf }
 0x1ef   : > { %835 = vmax.xlane.f32.xlu2 %v834_v56  ;;  %v964_v60 = vsel %vm830_vm4, %v960_v59, -inf  ;;  %v1737_v56 = vld [vmem:[%s2465_s11] ss:$0 sm:$0xff] }
 0x1f1   : > { %v820_v57 = vpop.f32.mrf.mxu2  ;;  %1077 = vmatpush.bf16.msra.mxu0 %v1629_v52  ;;  %v1740_v52 = vld [vmem:[%s687_s0] ss:$0 sm:$0xff] }
 0x1f2   : > { %v955_v58 = vpop.f32.mrf.mxu1 }
 0x1f4   : > { %981 = vrot.lane.b32.xlu0 %v2292_v19, %s2024_s29 }
 0x1f7   : > { %965 = vmax.xlane.f32.xlu2 %v964_v60 }
 0x20f   : > { %1002 = vrot.lane.b32.xlu2 %v933_v22, %s2024_s29 }
 0x253   : > { %v833_v61 = vpop.xlane.xlu0 %832 }
 0x254   : > { %v837_v62 = vsub.f32 %v828_v41, %v833_v61 }
 0x256   : > { %v839_v63 = vmul.f32 1.442695, %v837_v62 }
 0x258   : > { %1744 = vpow2.f32 %v839_v63 }
 0x25b   : > { %v963_v0 = vpop.xlane.xlu1 %962 }
 0x25c   : > { %v967_v1 = vsub.f32 %v959_v47, %v963_v0 }
 0x25e   : > { %v1745_v4 = vpop.eup %1744  ;;  %v969_v5 = vmul.f32 1.442695, %v967_v1  ;;  %v2026_v1 = vmov 32.0  }
 0x25f   : > { %v849_v6 = vpack.c.bf16 %v1745_v4, %v1745_v4  ;;  %v843_v20 = vsel %vm830_vm4, %v1745_v4, 0.0 }
 0x260   : > { %1746 = vpow2.f32 %v969_v5 }
 0x261   : > { %1571 = vmatmul.msk.bf16.vlgmr.msra.gmra.mxu3 %vm830_vm4, %v849_v6 }
 0x262   : > { %v836_v7 = vpop.xlane.xlu2 %835 }
 0x263   : > { %v838_v8 = vsub.f32 %v829_v54, %v836_v7 }
 0x265   : > { %v841_v9 = vmul.f32 1.442695, %v838_v8 }
 0x266   : > { %v1747_v10 = vpop.eup %1746  ;;  %v982_v11 = vpop.permute.xlu0 %981 }
 0x267   : > { %1748 = vpow2.f32 %v841_v9  ;;  %v973_v12 = vsel %vm830_vm4, %v1747_v10, 0.0  ;;  %v987_v13 = vsel %vm856_vm3, %v982_v11, 0  ;;  %v979_v14 = vpack.c.bf16 %v1747_v10, %v1747_v10 }
 0x268   : > { %974 = vadd.xlane.f32.xlu1 %v973_v12  ;;  %996 = vmatpush.bf16.msrb.mxu2 %v987_v13 }
 0x26a   : > { %v966_v15 = vpop.xlane.xlu2 %965 }
 0x26b   : > { %v968_v16 = vsub.f32 %v960_v59, %v966_v15  ;;  %1575 = vmatmul.msk.bf16.vlgmr.msrb.gmra.mxu2 %vm830_vm4, %v979_v14 }
 0x26d   : > { %v1749_v17 = vpop.eup %1748  ;;  %v971_v18 = vmul.f32 1.442695, %v968_v16 }
 0x26e   : > { %v846_v19 = vsel %vm830_vm4, %v1749_v17, 0.0  ;;  %v850_v21 = vpack.c.bf16 %v1749_v17, %v1749_v17 }
 0x26f   : > { %1750 = vpow2.f32 %v971_v18  ;;  %847 = vadd.xlane.f32.xlu2 %v846_v19  ;;  %v1632_v18 = vld [vmem:[%s2257_s15 + $0x8] sm:$0xff] }
 0x270   : > { %844 = vadd.xlane.f32.xlu1 %v843_v20  ;;  %1179 = vmatpush.bf16.msra.mxu1 %v1632_v18 }
 0x271   : > { %1572 = vmatmul.msk.bf16.vlgmr.msrb.gmra.mxu3 %vm830_vm4, %v850_v21 }
 0x272   : > { %v1003_v22 = vpop.permute.xlu2 %1002 }
 0x273   : > { %v1008_v23 = vsel %vm856_vm3, %v1003_v22, 0  ;;  %v1631_v22 = vld [vmem:[%s2257_s15] sm:$0xff] }
 0x274   : > { %1017 = vmatpush.bf16.msra.mxu3 %v1008_v23  ;;  %1180 = vmatpush.bf16.msra.mxu1 %v1631_v22 }
 0x275   : > { %v1751_v24 = vpop.eup %1750 }
 0x276   : > { %v976_v25 = vsel %vm830_vm4, %v1751_v24, 0.0  ;;  %v980_v26 = vpack.c.bf16 %v1751_v24, %v1751_v24 }
 0x277   : > { %977 = vadd.xlane.f32.xlu0 %v976_v25 }
 0x281   : > { %1576 = vmatmul.msk.bf16.vlgmr.msra.gmra.mxu3 %vm830_vm4, %v980_v26 }
 0x2db   : > { %v975_v27 = vpop.xlane.xlu1 %974 }
 0x2e2   : > { %v848_v31 = vpop.xlane.xlu2 %847 }
 0x2e3   : > { %v845_v28 = vpop.xlane.xlu1 %844 }
 0x2e4   : > { %1752 = vrcp.f32 %v845_v28  ;;  %v869_v29 = vpop.f32.mrf.mxu3 }
 0x2e5   : > { %1754 = vrcp.f32 %v975_v27 }
 0x2e6   : > { %1756 = vrcp.f32 %v848_v31 }
 0x2ea   : > { %v1753_v30 = vpop.eup %1752  ;;  %v978_v44 = vpop.xlane.xlu0 %977 }
 0x2eb   : > { %v896_v32 = vmul.f32 %v1753_v30, %v869_v29  ;;  %v1755_v35 = vpop.eup %1754  ;;  %1758 = vrcp.f32 %v978_v44 }
 0x2ec   : > { %v871_v33 = vpop.f32.mrf.mxu3  ;;  %v1757_v39 = vpop.eup %1756  ;;  %1760 = vrcp.f32 %v2026_v1 }
 0x2ed   : > { %v898_v34 = vpack.c.bf16 %v896_v32, %v896_v32 }
 0x2ee   : > { %v998_v36 = vpop.f32.mrf.mxu2 }
 0x2ef   : > { %901 = vst.msk [vmem:[#allocation4] sm:$0xf] %vm900_vm5, %v898_v34  ;;  %v1025_v37 = vmul.f32 %v1755_v35, %v998_v36 }
 0x2f1   : > { %v1027_v38 = vpack.c.bf16 %v1025_v37, %v1025_v37  ;;  %v1759_v46 = vpop.eup %1758 }
 0x2f2   : > { %v1761_v4 = vpop.eup %1760 }
 0x2f3   : > { %1031 = vrot.lane.b32.xlu1 %v1027_v38, %s2025_s28  ;;  %v1095_v5 = vmul.f32 32.0, %v1761_v4  ;;  %vm1099_vm7 = vweird.f32 %v1761_v4  ;;  %v1738_v38 = vld [vmem:[%s2466_s14] ss:$0 sm:$0xff] }
 0x2f4   : > { %v890_v40 = vpop.f32.mrf.mxu3 }
 0x2f5   : > { %v897_v41 = vmul.f32 %v1757_v39, %v890_v40  ;;  %v1096_v6 = vsub.f32 1.0, %v1095_v5 }
 0x2f6   : > { %v1000_v42 = vpop.f32.mrf.mxu2 }
 0x2f7   : > { %v899_v43 = vpack.c.bf16 %v897_v41, %v897_v41  ;;  %v1097_v7 = vmul.f32 %v1761_v4, %v1096_v6  ;;  %v1739_v42 = vld [vmem:[%s2467_s1] ss:$0 sm:$0xff] }
 0x2f9   : > { %902 = vst.msk [vmem:[#allocation4 + $0x4] sm:$0xf] %vm900_vm5, %v899_v43  ;;  %v1098_v8 = vadd.f32 %v1761_v4, %v1097_v7 }
 0x2fc   : > { %v892_v45 = vpop.f32.mrf.mxu3 }
 0x304   : > { %v1019_v47 = vpop.f32.mrf.mxu3 }
 0x305   : > { %v1026_v48 = vmul.f32 %v1759_v46, %v1019_v47 }
 0x307   : > { %v1028_v49 = vpack.c.bf16 %v1026_v48, %v1026_v48 }
 0x309   : > { %1033 = vrot.lane.b32.xlu1 %v1028_v49, %s2025_s28  ;;  %v1636_v49 = vld [vmem:[%s2267_s26 + $0x18] sm:$0xff] }
 0x30a   : > { %1250 = vmatpush.bf16.msra.mxu2 %v1636_v49  ;;  %v1743_v49 = vld [vmem:[%s2468_s2] ss:$0 sm:$0xff] }
 0x30c   : > { %v1021_v50 = vpop.f32.mrf.mxu3 }
 0x30d   : > { %v1635_v50 = vld [vmem:[%s2267_s26 + $0x10] sm:$0xff] }
 0x30e   : > { %1251 = vmatpush.bf16.msra.mxu2 %v1635_v50 }
 0x312   : > { %1252 = vmatpush.bf16.msra.mxu2 %v1634_v51 }
 0x365   : > { %v1032_v53 = vpop.permute.xlu1 %1031 }
 0x366   : > { %1038 = vst.msk [vmem:[#allocation4] sm:$0xf] %vm1037_vm6, %v1032_v53  ;;  %v1633_v53 = vld [vmem:[%s2267_s26] sm:$0xff] }
 0x367   : > { %1253 = vmatpush.bf16.msra.mxu2 %v1633_v53 }
 0x37b   : > { %v1034_v54 = vpop.permute.xlu1 %1033 }
 0x37c   : > { %1039 = vst.msk [vmem:[#allocation4 + $0x4] sm:$0xf] %vm1037_vm6, %v1034_v54 }
 0x383   : > { %v1628_v55 = vld [vmem:[#allocation4] sm:$0xff] }
 0x384   : > { %1589 = vmatmul.msk.bf16.vlgmr.msra.gmra.mxu0 %vm745_vm0, %v1628_v55 }
 0x401   : > { %v1079_v57 = vpop.f32.mrf.mxu0 }
 0x402   : > { %v1080_v58 = vadd.f32 %v1737_v56, %v1079_v57 }
 0x404   : > { %v1084_v59 = vadd.f32 %v1080_v58, %v2283_v2  ;;  %v2335_v2 = vsel %vm1099_vm7, %v1761_v4, %v1098_v8 }
 0x406   : > { %v1088_v60 = vsel %vm745_vm0, %v1084_v59, 0.0 }
 0x407   : > { %1089 = vadd.xlane.f32.xlu0 %v1088_v60 }
 0x409   : > { %v1081_v61 = vpop.f32.mrf.mxu0 }
 0x40a   : > { %v1082_v62 = vadd.f32 %v1737_v56, %v1081_v61 }
 0x40c   : > { %v1085_v63 = vadd.f32 %v1082_v62, %v2285_v3 }
 0x40e   : > { %v1091_v0 = vsel %vm745_vm0, %v1085_v63, 0.0 }
 0x40f   : > { %1092 = vadd.xlane.f32.xlu1 %v1091_v0 }
 0x47a   : > { %v1090_v9 = vpop.xlane.xlu0 %1089 }
 0x47b   : > { %v1101_v10 = vmul.f32 %v2335_v2, %v1090_v9 }
 0x47d   : > { %v1103_v11 = vsub.f32 %v1084_v59, %v1101_v10 }
 0x47f   : > { %v1105_v3 = vmul.f32 %v1103_v11, %v1103_v11 }
 0x481   : > { %v1107_v12 = vsel %vm745_vm0, %v1105_v3, 0.0 }
 0x482   : > { %v1093_v13 = vpop.xlane.xlu1 %1092  ;;  %1108 = vadd.xlane.f32.xlu0 %v1107_v12 }
 0x483   : > { %v1102_v14 = vmul.f32 %v2335_v2, %v1093_v13 }
 0x485   : > { %v1104_v15 = vsub.f32 %v1085_v63, %v1102_v14  ;;  %v1741_v14 = vld [vmem:[%s695_s18] ss:$0 sm:$0xff] }
 0x487   : > { %v1106_v16 = vmul.f32 %v1104_v15, %v1104_v15 }
 0x489   : > { %v1110_v17 = vsel %vm745_vm0, %v1106_v16, 0.0 }
 0x48a   : > { %1111 = vadd.xlane.f32.xlu2 %v1110_v17 }
 0x4f5   : > { %v1109_v19 = vpop.xlane.xlu0 %1108 }
 0x4f6   : > { %v1113_v20 = vmul.f32 %v1109_v19, %v2335_v2 }
 0x4f8   : > { %v1115_v21 = vadd.f32 1e-12, %v1113_v20 }
 0x4fa   : > { %1762 = vrsqrt.f32 %v1115_v21  ;;  %vm1123_vm9 = vweird.f32 %v1115_v21 }
 0x4fd   : > { %v1112_v23 = vpop.xlane.xlu2 %1111 }
 0x4fe   : > { %v1114_v24 = vmul.f32 %v1112_v23, %v2335_v2 }
 0x500   : > { %v1763_v25 = vpop.eup %1762  ;;  %v1116_v26 = vadd.f32 1e-12, %v1114_v24 }
 0x501   : > { %v1118_v27 = vmul.f32 %v1763_v25, %v1115_v21  ;;  %vm1124_vm8 = vweird.f32 %v1763_v25 }
 0x502   : > { %1764 = vrsqrt.f32 %v1116_v26  ;;  %vm1125_vm10 = vmor %vm1123_vm9, %vm1124_vm8  ;;  %vm1133_vm12 = vweird.f32 %v1116_v26 }
 0x503   : > { %v1119_v28 = vmul.f32 %v1763_v25, %v1118_v27 }
 0x505   : > { %v1120_v29 = vmul.f32 0.5, %v1119_v28 }
 0x507   : > { %v1121_v30 = vsub.f32 1.5, %v1120_v29 }
 0x508   : > { %v1765_v31 = vpop.eup %1764 }
 0x509   : > { %v1122_v32 = vmul.f32 %v1763_v25, %v1121_v30  ;;  %v1128_v33 = vmul.f32 %v1765_v31, %v1116_v26  ;;  %vm1134_vm11 = vweird.f32 %v1765_v31 }
 0x50a   : > { %vm1135_vm13 = vmor %vm1133_vm12, %vm1134_vm11 }
 0x50b   : > { %v1129_v34 = vmul.f32 %v1765_v31, %v1128_v33  ;;  %v1126_v35 = vsel %vm1125_vm10, %v1763_v25, %v1122_v32 }
 0x50c   : > { %v1137_v39 = vmul.f32 %v1126_v35, %v1103_v11 }
 0x50d   : > { %v1130_v36 = vmul.f32 0.5, %v1129_v34 }
 0x50e   : > { %v1142_v43 = vmul.f32 %v1738_v38, %v1137_v39 }
 0x50f   : > { %v1131_v37 = vsub.f32 1.5, %v1130_v36 }
 0x510   : > { %v1147_v46 = vadd.f32 %v1739_v42, %v1142_v43 }
 0x511   : > { %v1132_v40 = vmul.f32 %v1765_v31, %v1131_v37 }
 0x513   : > { %v1136_v41 = vsel %vm1135_vm13, %v1765_v31, %v1132_v40 }
 0x514   : > { %v1138_v44 = vmul.f32 %v1136_v41, %v1104_v15 }
 0x516   : > { %v1143_v45 = vmul.f32 %v1738_v38, %v1138_v44 }
 0x518   : > { %v1148_v47 = vadd.f32 %v1739_v42, %v1143_v45 }
 0x51a   : > { %v1149_v48 = vpack.c.bf16 %v1148_v47, %v1147_v46 }
 0x51c   : > { %1598 = vmatmul.msk.bf16.vlgmr.msra.gmra.mxu1 %vm745_vm0, %v1149_v48 }
 0x599   : > { %v1182_v54 = vpop.f32.mrf.mxu1 }
 0x59a   : > { %v1183_v55 = vadd.f32 %v1740_v52, %v1182_v54 }
 0x59c   : > { %v1187_v56 = vmul.f32 %v1183_v55, %v1183_v55  ;;  %v1197_v9 = vmul.f32 0.5, %v1183_v55 }
 0x59e   : > { %v1189_v57 = vmul.f32 %v1187_v56, %v1183_v55 }
 0x5a0   : > { %v1191_v58 = vmul.f32 0.044715, %v1189_v57 }
 0x5a1   : > { %v1184_v59 = vpop.f32.mrf.mxu1 }
 0x5a2   : > { %v1193_v60 = vadd.f32 %v1191_v58, %v1183_v55  ;;  %v1185_v61 = vadd.f32 %v1740_v52, %v1184_v59 }
 0x5a4   : > { %v1188_v62 = vmul.f32 %v1185_v61, %v1185_v61  ;;  %v1195_v63 = vmul.f32 0.7978846, %v1193_v60  ;;  %v1198_v10 = vmul.f32 0.5, %v1185_v61 }
 0x5a6   : > { %v1190_v0 = vmul.f32 %v1188_v62, %v1185_v61  ;;  %1766 = vtanh.f32 %v1195_v63 }
 0x5a8   : > { %v1192_v1 = vmul.f32 0.044715, %v1190_v0 }
 0x5aa   : > { %v1194_v4 = vadd.f32 %v1192_v1, %v1185_v61 }
 0x5ac   : > { %v1196_v5 = vmul.f32 0.7978846, %v1194_v4  ;;  %v1767_v6 = vpop.eup %1766 }
 0x5ad   : > { %v1201_v7 = vadd.f32 1.0, %v1767_v6 }
 0x5ae   : > { %1768 = vtanh.f32 %v1196_v5 }
 0x5af   : > { %v1203_v3 = vmul.f32 %v1201_v7, %v1197_v9 }
 0x5b4   : > { %v1769_v8 = vpop.eup %1768 }
 0x5b5   : > { %v1202_v11 = vadd.f32 1.0, %v1769_v8 }
 0x5b7   : > { %v1204_v12 = vmul.f32 %v1202_v11, %v1198_v10 }
 0x5b9   : > { %v1205_v13 = vpack.c.bf16 %v1204_v12, %v1203_v3 }
 0x5bb   : > { %1615 = vmatmul.msk.bf16.vlgmr.msra.gmra.mxu2 %vm1242_vm14, %v1205_v13 }
 0x63e   : > { %v1255_v15 = vpop.f32.mrf.mxu2 }
 0x63f   : > { %v1256_v16 = vadd.f32 %v1741_v14, %v1255_v15 }
 0x641   : > { %v1260_v17 = vadd.f32 %v1256_v16, %v1147_v46 }
 0x643   : > { %v1264_v18 = vsel %vm745_vm0, %v1260_v17, 0.0 }
 0x644   : > { %1265 = vadd.xlane.f32.xlu0 %v1264_v18 }
 0x646   : > { %v1257_v19 = vpop.f32.mrf.mxu2 }
 0x647   : > { %v1258_v20 = vadd.f32 %v1741_v14, %v1257_v19 }
 0x649   : > { %v1261_v21 = vadd.f32 %v1258_v20, %v1148_v47  ;;  %v1742_v47 = vld [vmem:[%s698_s9] ss:$0 sm:$0xff] }
 0x64b   : > { %v1267_v22 = vsel %vm745_vm0, %v1261_v21, 0.0 }
 0x64c   : > { %1268 = vadd.xlane.f32.xlu2 %v1267_v22 }
 0x6b7   : > { %v1266_v23 = vpop.xlane.xlu0 %1265 }
 0x6b8   : > { %v1270_v24 = vmul.f32 %v1266_v23, %v2335_v2 }
 0x6ba   : > { %v1272_v25 = vsub.f32 %v1260_v17, %v1270_v24 }
 0x6bc   : > { %v1274_v26 = vmul.f32 %v1272_v25, %v1272_v25 }
 0x6be   : > { %v1276_v27 = vsel %vm745_vm0, %v1274_v26, 0.0 }
 0x6bf   : > { %v1269_v28 = vpop.xlane.xlu2 %1268  ;;  %1277 = vadd.xlane.f32.xlu0 %v1276_v27 }
 0x6c0   : > { %v1271_v29 = vmul.f32 %v1269_v28, %v2335_v2 }
 0x6c2   : > { %v1273_v30 = vsub.f32 %v1261_v21, %v1271_v29 }
 0x6c4   : > { %v1275_v31 = vmul.f32 %v1273_v30, %v1273_v30 }
 0x6c6   : > { %v1279_v32 = vsel %vm745_vm0, %v1275_v31, 0.0 }
 0x6c7   : > { %1280 = vadd.xlane.f32.xlu2 %v1279_v32 }
 0x732   : > { %v1278_v33 = vpop.xlane.xlu0 %1277 }
 0x733   : > { %v1282_v34 = vmul.f32 %v1278_v33, %v2335_v2 }
 0x735   : > { %v1284_v35 = vadd.f32 1e-12, %v1282_v34 }
 0x737   : > { %1770 = vrsqrt.f32 %v1284_v35  ;;  %vm1292_vm1 = vweird.f32 %v1284_v35 }
 0x73a   : > { %v1281_v36 = vpop.xlane.xlu2 %1280 }
 0x73b   : > { %v1283_v37 = vmul.f32 %v1281_v36, %v2335_v2 }
 0x73d   : > { %v1771_v38 = vpop.eup %1770  ;;  %v1285_v39 = vadd.f32 1e-12, %v1283_v37 }
 0x73e   : > { %v1287_v40 = vmul.f32 %v1771_v38, %v1284_v35  ;;  %vm1293_vm15 = vweird.f32 %v1771_v38 }
 0x73f   : > { %1772 = vrsqrt.f32 %v1285_v39  ;;  %vm1294_vm2 = vmor %vm1292_vm1, %vm1293_vm15  ;;  %vm1302_vm4 = vweird.f32 %v1285_v39 }
 0x740   : > { %v1288_v41 = vmul.f32 %v1771_v38, %v1287_v40 }
 0x742   : > { %v1289_v42 = vmul.f32 0.5, %v1288_v41 }
 0x744   : > { %v1290_v43 = vsub.f32 1.5, %v1289_v42 }
 0x745   : > { %v1773_v44 = vpop.eup %1772 }
 0x746   : > { %v1291_v45 = vmul.f32 %v1771_v38, %v1290_v43  ;;  %v1297_v46 = vmul.f32 %v1773_v44, %v1285_v39  ;;  %vm1303_vm3 = vweird.f32 %v1773_v44 }
 0x747   : > { %vm1304_vm5 = vmor %vm1302_vm4, %vm1303_vm3 }
 0x748   : > { %v1295_v2 = vsel %vm1294_vm2, %v1771_v38, %v1291_v45  ;;  %v1298_v48 = vmul.f32 %v1773_v44, %v1297_v46 }
 0x749   : > { %v1306_v50 = vmul.f32 %v1295_v2, %v1272_v25 }
 0x74a   : > { %v1299_v51 = vmul.f32 0.5, %v1298_v48 }
 0x74b   : > { %v1311_v52 = vmul.f32 %v1742_v47, %v1306_v50 }
 0x74c   : > { %v1300_v53 = vsub.f32 1.5, %v1299_v51 }
 0x74d   : > { %v1316_v54 = vadd.f32 %v1743_v49, %v1311_v52 }
 0x74e   : > { %v1301_v55 = vmul.f32 %v1773_v44, %v1300_v53 }
 0x74f   : > { %1318 = vst.msk [vmem:[#allocation2] sm:$0xff] %vm745_vm0, %v1316_v54 }
 0x750   : > { %v1305_v56 = vsel %vm1304_vm5, %v1773_v44, %v1301_v55 }
 0x751   : > { %v1307_v57 = vmul.f32 %v1305_v56, %v1273_v30 }
 0x753   : > { %v1312_v58 = vmul.f32 %v1742_v47, %v1307_v57  ;;  %1323 = sbr.rel (%p1616_p3) target bundleno = 1888 (0x760), region = 100 }
 0x755   : > { %v1317_v59 = vadd.f32 %v1743_v49, %v1312_v58 }
 0x757   : > { %1319 = vst.msk [vmem:[#allocation2 + $0x8] sm:$0xff] %vm745_vm0, %v1317_v59 }
 0x758   : > { %vm1325_vm6 = vcmask 254976  }
 0x75e   : > { %v1324_v60 = vld [vmem:[#allocation2] ss:$8 sm:$0x3] }
 0x75f   : > { %1326 = vst.msk [vmem:[#allocation14] sm:$0x3] %vm1325_vm6, %v1324_v60 }
 0x760 PF: > { %s2469_s3 = sld [smem:[#allocation29_spill]]  ;;  %s2027_s17 = smov [#allocation14]  }
 0x761   : > { %s2470_s4 = sld [smem:[#allocation41_spill]]  ;;  %s1335_s22 = sshll.u32 %s2027_s17, 4  ;;  %s1336_s22 = int_to_ptr.vmem [resolvable:$true] %s1335_s22 }
 0x766   : > { %p1676_p4 = scmp.eq.s32.totalorder %s2469_s3, 1 }
 0x767   : > { %s1337_s7 = sshll.u32 %s2470_s4, 4  ;;  %s1338_s7 = int_to_ptr.hbm [resolvable:$true] %s1337_s7 }
 0x768   : > { %1655 = dma.vmem_to_hbm [thread:$0]  (%p1676_p4), %s1336_s22, 32, %s1338_s7, [#allocation8]  }
 0x769   : > { %1991 = dma.done.wait (%p1676_p4), [#allocation8], 32  }
 0x76a   : > { %1993 = vsyncadd (%p1676_p4), [#allocation8], 4294967264 }
 0x76b PF: > { %s2471_s16 = sld [smem:[#allocation26_spill]]  ;;  %s2476_s29 = smov %s2000_s30 }
 0x76c   : > { %s2472_s28 = sld [smem:[#allocation24_spill]] }
 0x76d   : > { %s2473_s15 = sld [smem:[#allocation28_spill]] }
 0x76e   : > { %s2475_s17 = sld [smem:[#allocation27_spill]] }
 0x771   : > { %s32_s18 = sadd.s32 1, %s2471_s16   ;;  %s2474_s16 = sld [smem:[#allocation25_spill]] }
 0x772   : > { %p29_p5 = scmp.ge.s32.totalorder %s32_s18, 4   ;;  %s2477_s30 = smov %s2472_s28 }
 0x774   :  { %31 = sbr.rel (!%p29_p5) target bundleno = 21 (0x15), region = 180 }
 0x779   :  { %1351 = vsyncpa [#allocation7], 1 }
 0x77a   :  { %1353 = vsyncpa [#allocation7 + $0x1], 1 }
 0x77b   :  { %1354 = vsyncpa [#allocation10], 1 }
 0x77c   :  { %1356 = vsyncpa [#allocation10 + $0x1], 1 }
 0x77d   :  { %1357 = vsyncpa [#allocation13], 1 }
 0x77e   :  { %1359 = vsyncpa [#allocation13 + $0x1], 1 }
 0x77f   :  { %1360 = vsyncpa [#allocation8], 1 }
 0x780   :  { %1362 = vsyncpa [#allocation8 + $0x1], 1 }
 0x781   :  { %1363 = vsyncmov [#allocation5] }
 0x784   :  { %s1364_s21 = vpop.sfrf %1363 }
 0x785   :  { %p1621_p6 = scmp.ne.s32.totalorder %s1364_s21, 0 }
 0x787   :  { %1368 = shalt.err (%p1621_p6)  }

</bundles_post_ra>
